<compile_context>
chip_gen: v7x
topology: tpu7x:2x2x1
jax: 0.10.0
libtpu: 0.0.40
codegen_flags: <defaults>
</compile_context>

<pallas_src>
import functools

import jax
import jax.numpy as jnp
import numpy as np
from jax.experimental import pallas as pl
from jax.experimental.pallas import tpu as pltpu

_EPS = 1e-5
_NEG_SLOPE = 0.1


def _lbr_kernel(x_ref, w_ref, o_ref, *, compute_dtype):
    # x_ref : (1, in_ch, L)     full sequence for batch b (VMEM-resident)
    # w_ref : (tile_oc, in_ch)  slice of the linear weight
    # o_ref : (1, tile_oc, L)   output tile
    x = x_ref[0]                                   # (in_ch, L)
    w = w_ref[...]                                 # (tile_oc, in_ch)
    if x.dtype != compute_dtype:
        # bf16 MXU inputs when requested; accumulation stays f32 below.
        x = x.astype(compute_dtype)
        w = w.astype(compute_dtype)

    # Linear in NCL layout: y = W @ x.  (Bias omitted: a per-channel constant
    # is exactly cancelled by the InstanceNorm mean subtraction.)
    y = jnp.dot(w, x, preferred_element_type=jnp.float32)   # (tile_oc, L) f32

    # InstanceNorm (affine=False, biased variance over L).  Two-pass centered
    # statistics: y is fully resident in VMEM, so this costs the same number of
    # VPU passes as E[y^2]-mean^2 but avoids catastrophic cancellation.
    mean = jnp.mean(y, axis=-1, keepdims=True)               # (tile_oc, 1)
    d = y - mean
    var = jnp.maximum(jnp.mean(d * d, axis=-1, keepdims=True), 0.0)
    inv_std = jax.lax.rsqrt(var + _EPS)

    y_n = d * inv_std
    o_ref[0] = jnp.where(y_n >= 0, y_n, _NEG_SLOPE * y_n).astype(o_ref.dtype)


def _round_up(x, m):
    return ((x + m - 1) // m) * m


def _vmem_budget():
    """Per-generation VMEM budget/limit (v5e/v6e: 128 MiB, v7x: 64 MiB/TC)."""
    try:
        cap = int(pltpu.get_tpu_info().vmem_capacity_bytes)
    except Exception:
        cap = 64 << 20                     # conservative (v7x per-TC) fallback
    budget = (cap * 3) // 4                # ~96 MiB on v5e/v6e, ~48 MiB on v7x
    limit = cap - cap // 8                 # ~112 / ~56 MiB; headroom for scratch
    return budget, limit


def _choose_tile_oc(out_ch, in_ch, L, B, budget):
    """Pick the OC tile: collapse the axis if it fits, else 128-multiples."""
    def step_bytes(t):
        # Double-buffered x block + weight tile + output tile (f32 worst case).
        return 2 * (in_ch * L * 4 + t * in_ch * 4 + t * L * 4)

    # With B == 1 a single grid point would leave one v7x TensorCore idle, so
    # split OC when it is big enough (no-op on v5e/v6e).
    want_split = (B == 1 and out_ch >= 256)

    if step_bytes(out_ch) <= budget and not want_split:
        return out_ch                      # single tile, c axis collapsed

    gran = 128 if out_ch >= 256 else 8
    cap = _round_up(out_ch, gran)
    if want_split:
        cap = _round_up((out_ch + 1) // 2, gran)
    tile = cap
    while tile > gran and step_bytes(tile) > budget:
        tile -= gran
    if gran == 128 and step_bytes(tile) > budget:
        # Forced below a full MXU tile by VMEM; fall back to 8-granularity.
        gran, tile = 8, 128
        while tile > gran and step_bytes(tile) > budget:
            tile -= gran
    return tile


def linear_batch_relu(x, weight, bias=None, *, use_bf16_matmul=None):
    """Forward of LinearBatchRelu.

    x: (B, in_ch, L) f32; weight: (out_ch, in_ch); bias: (out_ch,) or None.
    The bias is accepted for interface parity but not used: InstanceNorm1d
    (affine=False) subtracts the per-(batch, channel) mean over L, which
    exactly cancels any per-channel constant added before it.

    use_bf16_matmul: None = auto (bf16 MXU inputs when in_ch >= 128), or force
    True / False.  Statistics and normalization always run in f32.
    """
    del bias  # mathematically a no-op before InstanceNorm

    B, in_ch, L = x.shape
    out_ch = weight.shape[0]

    budget, vmem_limit = _vmem_budget()
    tile_oc = _choose_tile_oc(out_ch, in_ch, L, B, budget)
    n_c = -(-out_ch // tile_oc)            # ceil-div

    # Only the (tiny) weight is ever padded, and only when the OC tiling does
    # not divide out_ch.  x is never padded and the output is never sliced:
    # boundary output blocks are write-masked by Pallas.
    w_rows = n_c * tile_oc
    w_in = weight if w_rows == out_ch else jnp.pad(
        weight, ((0, w_rows - out_ch), (0, 0)))

    if use_bf16_matmul is None:
        use_bf16_matmul = in_ch >= 128
    compute_dtype = jnp.bfloat16 if use_bf16_matmul else jnp.float32

    kernel = functools.partial(_lbr_kernel, compute_dtype=compute_dtype)

    return pl.pallas_call(
        kernel,
        out_shape=jax.ShapeDtypeStruct((B, out_ch, L), x.dtype),
        grid_spec=pltpu.PrefetchScalarGridSpec(
            num_scalar_prefetch=0,
            grid=(B, n_c),
            in_specs=[
                pl.BlockSpec((1, in_ch, L), lambda b, c: (b, 0, 0)),
                pl.BlockSpec((tile_oc, in_ch), lambda b, c: (c, 0)),
            ],
            out_specs=pl.BlockSpec((1, tile_oc, L), lambda b, c: (b, c, 0)),
        ),
        compiler_params=pltpu.CompilerParams(
            dimension_semantics=("parallel", "parallel"),
            vmem_limit_bytes=int(vmem_limit),
        ),
    )(x, w_in)


def _reference(x, weight, bias):
    # Pure-JAX reference replicating the PyTorch module semantics (bias kept
    # here on purpose, to verify that dropping it in the kernel is exact).
    y = jnp.einsum("bcl,oc->bol", x, weight) + bias[None, :, None]
    mean = jnp.mean(y, axis=-1, keepdims=True)
    var = jnp.mean((y - mean) ** 2, axis=-1, keepdims=True)   # biased variance
    y_n = (y - mean) / jnp.sqrt(var + _EPS)
    return jnp.where(y_n >= 0, y_n, _NEG_SLOPE * y_n)


def _run_case(key, B, in_ch, out_ch, L):
    kx, kw, kb = jax.random.split(key, 3)
    x = jax.random.normal(kx, (B, in_ch, L), dtype=jnp.float32)
    # Deterministic init mimicking nn.Linear's uniform(-1/sqrt(in), 1/sqrt(in)).
    bound = 1.0 / np.sqrt(in_ch)
    weight = jax.random.uniform(kw, (out_ch, in_ch), jnp.float32, -bound, bound)
    bias = jax.random.uniform(kb, (out_ch,), jnp.float32, -bound, bound)

    out = linear_batch_relu(x, weight, bias)
    out = jax.block_until_ready(out)

    ref = _reference(x, weight, bias)
    np.testing.assert_allclose(np.asarray(out), np.asarray(ref),
                               rtol=1e-5, atol=1e-5)


if __name__ == "__main__":
    key = jax.random.PRNGKey(0)
    k0, k1 = jax.random.split(key)

    # Small, module-consistent shapes.
    _run_case(k0, B=2, in_ch=4, out_ch=8, L=16)
    # Odd, unaligned dims: exercises the no-pad / no-slice path with masked
    # boundary stores.
    _run_case(k1, B=1, in_ch=5, out_ch=10, L=33)

    print("KERNEL_OK")
</pallas_src>

<mosaic_0001>
module attributes {stable_mosaic.version = 11 : i64} {
  func.func @_lbr_kernel(%arg0: i32, %arg1: i32, %arg2: memref<1x4x16xf32, #tpu.memory_space<vmem>>, %arg3: memref<8x4xf32, #tpu.memory_space<vmem>>, %arg4: memref<1x8x16xf32, #tpu.memory_space<vmem>>) attributes {dimension_semantics = [#tpu.dimension_semantics<parallel>, #tpu.dimension_semantics<parallel>], iteration_bounds = array<i64: 2, 1>, scalar_prefetch = 0 : i64, scratch_operands = 0 : i64, tpu.core_type = #tpu.core_type<tc>, window_params = [{transform_indices = @transform_0, window_bounds = array<i64: 1, 4, 16>}, {transform_indices = @transform_1, window_bounds = array<i64: 8, 4>}, {transform_indices = @transform_2, window_bounds = array<i64: 1, 8, 16>}]} {
    %c0 = arith.constant 0 : index
    %c0_0 = arith.constant 0 : index
    %c0_1 = arith.constant 0 : index
    %0 = vector.load %arg2[%c0, %c0_0, %c0_1] : memref<1x4x16xf32, #tpu.memory_space<vmem>>, vector<1x4x16xf32>
    %1 = vector.shape_cast %0 : vector<1x4x16xf32> to vector<4x16xf32>
    %c0_2 = arith.constant 0 : index
    %c0_3 = arith.constant 0 : index
    %2 = vector.load %arg3[%c0_2, %c0_3] : memref<8x4xf32, #tpu.memory_space<vmem>>, vector<8x4xf32>
    %cst = arith.constant dense<0.000000e+00> : vector<8x16xf32>
    %3 = tpu.matmul %2, %1, %cst {dimension_numbers = #tpu.dot_dimension_numbers<[1], [0], [0], [1], [0, 0, 1, 1], [], []>} : vector<8x4xf32>, vector<4x16xf32>, vector<8x16xf32> -> vector<8x16xf32>
    %cst_4 = arith.constant dense<0.000000e+00> : vector<8xf32>
    %4 = vector.multi_reduction <add>, %3, %cst_4 [1] : vector<8x16xf32> to vector<8xf32>
    %5 = vector.shape_cast %4 : vector<8xf32> to vector<8x1xf32>
    %cst_5 = arith.constant 1.600000e+01 : f32
    %6 = vector.broadcast %cst_5 : f32 to vector<8x1xf32>
    %7 = arith.divf %5, %6 : vector<8x1xf32>
    %8 = vector.broadcast %7 : vector<8x1xf32> to vector<8x16xf32>
    %9 = arith.subf %3, %8 : vector<8x16xf32>
    %10 = arith.mulf %9, %9 : vector<8x16xf32>
    %cst_6 = arith.constant dense<0.000000e+00> : vector<8xf32>
    %11 = vector.multi_reduction <add>, %10, %cst_6 [1] : vector<8x16xf32> to vector<8xf32>
    %12 = vector.shape_cast %11 : vector<8xf32> to vector<8x1xf32>
    %cst_7 = arith.constant 1.600000e+01 : f32
    %13 = vector.broadcast %cst_7 : f32 to vector<8x1xf32>
    %14 = arith.divf %12, %13 : vector<8x1xf32>
    %cst_8 = arith.constant 0.000000e+00 : f32
    %15 = vector.broadcast %cst_8 : f32 to vector<8x1xf32>
    %16 = arith.maximumf %14, %15 : vector<8x1xf32>
    %cst_9 = arith.constant 9.99999974E-6 : f32
    %17 = vector.broadcast %cst_9 : f32 to vector<8x1xf32>
    %18 = arith.addf %16, %17 : vector<8x1xf32>
    %19 = math.rsqrt %18 : vector<8x1xf32>
    %20 = vector.broadcast %19 : vector<8x1xf32> to vector<8x16xf32>
    %21 = arith.mulf %9, %20 : vector<8x16xf32>
    %cst_10 = arith.constant 0.000000e+00 : f32
    %22 = vector.broadcast %cst_10 : f32 to vector<8x16xf32>
    %23 = arith.cmpf oge, %21, %22 : vector<8x16xf32>
    %cst_11 = arith.constant 1.000000e-01 : f32
    %24 = vector.broadcast %cst_11 : f32 to vector<8x16xf32>
    %25 = arith.mulf %24, %21 : vector<8x16xf32>
    %26 = arith.select %23, %21, %25 : vector<8x16xi1>, vector<8x16xf32>
    %c0_12 = arith.constant 0 : index
    %c0_13 = arith.constant 0 : index
    %c0_14 = arith.constant 0 : index
    %27 = vector.load %arg4[%c0_12, %c0_13, %c0_14] : memref<1x8x16xf32, #tpu.memory_space<vmem>>, vector<1x8x16xf32>
    %28 = vector.shape_cast %27 : vector<1x8x16xf32> to vector<8x16xf32>
    %29 = vector.shape_cast %26 : vector<8x16xf32> to vector<1x8x16xf32>
    tpu.vector_store %arg4[%c0_12, %c0_13, %c0_14], %29 {strides = array<i32>} : memref<1x8x16xf32, #tpu.memory_space<vmem>>, vector<1x8x16xf32>,
    return
  }
  func.func @transform_0(%arg0: i32, %arg1: i32) -> (i32, i32, i32) {
    %c0_i32 = arith.constant 0 : i32
    %c0_i32_0 = arith.constant 0 : i32
    %c0_i32_1 = arith.constant 0 : i32
    return %arg0, %c0_i32, %c0_i32_0 : i32, i32, i32
  }
  func.func @transform_1(%arg0: i32, %arg1: i32) -> (i32, i32) {
    %c0_i32 = arith.constant 0 : i32
    %c0_i32_0 = arith.constant 0 : i32
    return %arg1, %c0_i32 : i32, i32
  }
  func.func @transform_2(%arg0: i32, %arg1: i32) -> (i32, i32, i32) {
    %c0_i32 = arith.constant 0 : i32
    %c0_i32_0 = arith.constant 0 : i32
    return %arg0, %arg1, %c0_i32 : i32, i32, i32
  }
}

</mosaic_0001>

<bundles_post_ra>
// kernel: tpu_custom_call.1
= control target key start
LH: loop header
LB: loop body
LE: loop exit
PB: predicated region body
PF: predicated region fallthrough
CT: control target
= control target key end

     0   :  { %7 = vsyncpa [#allocation3], 0  ;;  %s664_s0 = inlined_call_operand.vmem [shape: f32[2,4,16], index: 0, kind: input, shape index: {}]   ;;  %s665_s1 = inlined_call_operand.vmem [shape: f32[8,4], index: 1, kind: input, shape index: {}]   ;;  %s666_s2 = inlined_call_operand.hbm [shape: f32[2,8,16], index: 2, kind: output, shape index: {}]  }
   0x1   :  { %9 = vsyncpa [#allocation3 + $0x1], 0  ;;  %s546_s9 = smov 0   ;;  %s548_s10 = smov 0  }
   0x2   :  { %s550_s11 = smov 0   ;;  %s552_s12 = smov 0  }
   0x3   :  { %s554_s13 = smov 0   ;;  %s556_s14 = smov 0  }
   0x4 LB: > { %s368_s15 = sadd.s32 4294967295, %s526_s14   ;;  %s369_s16 = sadd.s32 4294967294, %s526_s14   ;;  %s526_s14 = sphi %s556_s14, %s15_s14   ;;  %s522_s13 = sphi %s554_s13, %s673_s13   ;;  %s518_s12 = sphi %s552_s12, %s672_s12   ;;  %s514_s11 = sphi %s550_s11, %s671_s11   ;;  %s510_s10 = sphi %s548_s10, %s670_s10   ;;  %s506_s9 = sphi %s546_s9, %s669_s9  }
   0x5   : > { %s27_s17 = sadd.s32 1, %s522_s13  ;;  %s88_s18 = sadd.s32 1, %s514_s11 }
   0x6   : > { %p29_p0 = scmp.ge.s32.totalorder %s27_s17, 2  ;;  %p98_p1 = scmp.ne.s32.totalorder %s514_s11, %s510_s10 }
   0x7   : > { %p99_p2 = scmp.eq.s32.totalorder %s368_s15, 1  ;;  %p104_p3 = scmp.ne.s32.totalorder %s510_s10, %s506_s9 }
   0x8   : > { %s675_s17 = smov (%p29_p0, %s27_s17), 0  ;;  %p105_p5 = scmp.eq.s32.totalorder %s369_s16, 1 }
   0x9   : > { %p586_p4 = por %p99_p2, %p98_p1  ;;  %s83_s20 = ssub.s32 %s522_s13, %s675_s17 }
   0xa   : > { %p373_p6 = scmp.ge.s32.totalorder %s526_s14, 1  ;;  %p86_p7 = scmp.eq.s32.totalorder %s83_s20, 0 }
   0xb   : > { %p593_p8 = por %p105_p5, %p104_p3  ;;  %p137_p9 = scmp.lt.s32.totalorder %s526_s14, 3 }
   0xc   : > { %s599_s22 = scalar_select %p86_p7, %s514_s11, %s88_s18  }
   0xd   : > { %p138_p10 = pnand %p373_p6, %p137_p9 }
   0xe   : > { %p162_p11 = scmp.lt.s32.totalorder (!%p138_p10), %s518_s12, 1  ;;  %v528_v0 = vmov (!%p138_p10), 0.0   ;;  %vm529_vm0 = vmmov (!%p138_p10), 0   ;;  %vm176_vm1 = vcmask (!%p138_p10), 1043456   ;;  %v171_v1 = vld [vmem:[%s665_s1] sm:$0xff] (!%p138_p10)  ;;  %vm172_vm2 = vcmask (!%p138_p10), 31744  }
   0xf   : > { %141 = sbr.rel (%p138_p10) target bundleno = 568 (0x238), region = 28  ;;  %384 = vmatprep.subr.mxu0 (!%p138_p10), %v528_v0  ;;  %386 = vmatprep.mubr.msk.f32.mxu0 (!%p138_p10), %vm529_vm0, %v528_v0  ;;  %vm250_vm3 = vcmask (!%p138_p10), 130048   ;;  %s159_s30 = sand.u32 (!%p138_p10), 1, %s510_s10  }
  0x10   : > { %s374_s3 = sshll.u32 (!%p138_p10), %s159_s30, 3  ;;  %s379_s4 = sshll.u32 (!%p138_p10), %s518_s12, 7 }
  0x11   : > { %s161_s5 = scalar_lea.vmem (!%p138_p10), [#allocation2], %s374_s3  ;;  %s616_s15 = scalar_lea.hbm (!%p138_p10), %s666_s2, %s379_s4 }
  0x12   : > { %s285_s6 = sshll.u32 (!%p138_p10), %s161_s5, 4  ;;  %s271_s16 = scalar_lea.sflag (!%p138_p10), [#allocation3], %s159_s30  ;;  %s618_s6 = int_to_ptr.vmem [resolvable:$true] %s285_s6 }
  0x13   : > { %s448_s18 = scalar_lea.vmem (!%p138_p10), %s618_s6, 128 }
  0x14   : > { %p449_p12 = scmp.ne.s32.totalorder (!%p138_p10), %s618_s6, %s448_s18 }
  0x16   : > { %s163_s23 = scalar_select %p162_p11, %s518_s12, 1 }
  0x17   : > { %p450_p13 = pnand %p449_p12, %p586_p4  ;;  %s530_s12 = smov [#allocation2]  }
  0x18   : > { %s375_s24 = sshll.u32 %s163_s23, 2  ;;  %s452_s20 = sshll.u32 %s530_s12, 4  ;;  %s453_s20 = int_to_ptr.vmem [resolvable:$false] %s452_s20 }
  0x19   : > { %s165_s27 = scalar_lea.vmem %s664_s0, %s375_s24  ;;  %p451_p0 = pneg %p450_p13 }
  0x1a   : > { %v170_v2 = vld [vmem:[%s165_s27] sm:$0xf]  ;;  %s454_s23 = scalar_lea.vmem %s453_s20, 256  ;;  %p455_p1 = scmp.lt.s32.totalorder %s618_s6, %s453_s20 }
  0x1b   : > { %385 = vmatpush3.msk.msra.mxu0 %vm176_vm1, %v170_v2  ;;  %p456_p2 = scmp.lt.s32.totalorder %s454_s23, %s448_s18 }
  0x1c   : > { %387 = vmatmul.mubr.msk.f32.vlgmr.msra.gmra.mrb[0].mxu0 %vm172_vm2, %v171_v1 }
  0x1d   : > { %p457_p3 = por %p456_p2, %p455_p1 }
  0x1f   : > { %p458_p5 = pnand %p457_p3, %p451_p0 }
  0xef   : > { %v246_v3 = vpop.f32.mrb[0].mxu0 }
  0xf0   : > { %v388_v4 = vpop.f32.mrb[1].mxu0  ;;  %v251_v5 = vsel %vm250_vm3, %v246_v3, 0.0 }
  0xf1   : > { %252 = vadd.xlane.f32.xlu0 %v251_v5 }
 0x17e   : > { %v253_v6 = vpop.xlane.xlu0 %252 }
 0x17f   : > { %v255_v7 = vmul.f32 0.0625, %v253_v6 }
 0x181   : > { %v256_v8 = vsub.f32 %v246_v3, %v255_v7 }
 0x183   : > { %v257_v9 = vmul.f32 %v256_v8, %v256_v8 }
 0x185   : > { %v258_v10 = vsel %vm250_vm3, %v257_v9, 0.0 }
 0x186   : > { %259 = vadd.xlane.f32.xlu0 %v258_v10 }
 0x213   : > { %v260_v11 = vpop.xlane.xlu0 %259 }
 0x214   : > { %v261_v12 = vmul.f32 0.0625, %v260_v11 }
 0x216   : > { %v262_v13 = vmax.f32 %v261_v12, 0.0 }
 0x218   : > { %v263_v14 = vadd.f32 1e-05, %v262_v13 }
 0x21a   : > { %446 = vrsqrt.f32 %v263_v14 }
 0x224   : > { %v447_v15 = vpop.eup %446 }
 0x225   : > { %v265_v16 = vmul.f32 %v447_v15, %v256_v8 }
 0x227   : > { %vm266_vm4 = vcmp.ge.f32.partialorder %v265_v16, 0.0  ;;  %v267_v17 = vmul.f32 0.1, %v265_v16 }
 0x229   : > { %v268_v18 = vsel %vm266_vm4, %v265_v16, %v267_v17 }
 0x22a   : > { %269 = vst.msk [vmem:[%s161_s5] sm:$0xff] %vm250_vm3, %v268_v18 }
 0x22b   : > { %461 = shalt.err (!%p458_p5)
}
 0x22c   : > { %s462_s24 = scalar_lea.hbm %s616_s15, 128  ;;  %s466_s27 = scalar_lea.hbm %s666_s2, 256 }
 0x22d   : > { %p463_p6 = scmp.ne.s32.totalorder %s616_s15, %s462_s24  ;;  %p467_p10 = scmp.lt.u32.totalorder %s616_s15, %s666_s2 }
 0x22e   : > { %p468_p11 = scmp.lt.u32.totalorder %s466_s27, %s462_s24  ;;  %p470_p13 = scmp.lt.u32.totalorder %s462_s24, %s616_s15 }
 0x22f   : > { %p464_p7 = pnand %p463_p6, %p586_p4 }
 0x230   : > { %p469_p12 = por %p468_p11, %p467_p10 }
 0x231   : > { %p465_p9 = pneg %p464_p7 }
 0x232   : > { %p471_p0 = por %p470_p13, %p469_p12 }
 0x234   : > { %p472_p1 = pnand %p471_p0, %p465_p9 }
 0x236   : > { %475 = shalt.err (!%p472_p1)
}
 0x237   : > { %389 = dma.vmem_to_hbm [thread:$0]  (%p586_p4), %s618_s6, 128, %s616_s15, %s271_s16  }
 0x238 PF: > { %p395_p2 = scmp.ge.s32.totalorder %s526_s14, 2  ;;  %s297_s30 = sand.u32 1, %s506_s9  }
 0x239   : > { %s298_s3 = scalar_lea.sflag [#allocation3], %s297_s30 }
 0x23a   : > { %p392_p3 = pnand %p395_p2, %p593_p8 }
 0x23c   : > { %501 = dma.done.wait (!%p392_p3), %s298_s3, 128  }
 0x23d   : > { %503 = vsyncadd (!%p392_p3), %s298_s3, 4294967168  ;;  %s15_s14 = sadd.s32 1, %s526_s14   ;;  %s669_s9 = smov %s510_s10 }
 0x23e   : > { %p12_p5 = scmp.ge.s32.totalorder %s15_s14, 4   ;;  %s670_s10 = smov %s514_s11 }
 0x23f   : > { %s671_s11 = smov %s599_s22  ;;  %s672_s12 = smov %s522_s13 }
 0x240   : > { %s673_s13 = smov %s675_s17  ;;  %14 = sbr.rel (!%p12_p5) target bundleno = 4 (0x4), region = 66 }
 0x247   :  { %303 = vsyncpa [#allocation3], 1 }
 0x248   :  { %305 = vsyncpa [#allocation3 + $0x1], 1 }

</bundles_post_ra>
